<compile_context>
chip_gen: v7x
topology: tpu7x:2x2x1
jax: 0.10.0
libtpu: 0.0.40
codegen_flags: <defaults>
</compile_context>

<pallas_src>
import functools

import jax
import jax.numpy as jnp
from jax.experimental import pallas as pl
from jax.experimental.pallas import tpu as pltpu

_LANE = 128          # vreg lane width
_BF16_SUBLANE = 16   # bf16 sublane packing (one bf16 vreg holds [16, 128])


def _round_up(v, m):
    return (v + m - 1) // m * m


def _vmem_limit_bytes():
    """Generation-aware scoped-VMEM limit (v7x: 64 MiB physical/TC, v5e/v6e: 128 MiB)."""
    try:
        info = pltpu.get_tpu_info()
        cap = int(getattr(info, "vmem_capacity_bytes", 0) or 0)
    except Exception:
        cap = 0
    if cap <= 0:
        cap = 64 * 1024 * 1024  # conservative fallback
    return min(cap * 3 // 4, 100 * 1024 * 1024)


# ---------------------------------------------------------------------------
# One-time data prep (do this once, outside the per-step forward)
# ---------------------------------------------------------------------------
def prepare_graphsage_inputs(params, x, adj):
    """Pad node/feature dims to TPU tile multiples, cast MXU operands to bf16,
    and re-pack each [2*F_in, F_out] weight into a lane-padded layout so
    concat([x, mes]) @ W is a single matmul."""
    n, nfeat = x.shape
    nclass = params[-1].shape[1]

    f_ins = [w.shape[0] // 2 for w in params]
    f_outs = [w.shape[1] for w in params]
    f_in_p = [_round_up(f, _LANE) for f in f_ins]
    f_out_p = [_round_up(f, _LANE) for f in f_outs]
    n_pad = _round_up(max(n, _BF16_SUBLANE), _BF16_SUBLANE)

    assert nfeat == f_ins[0]
    x_p = jnp.pad(x, ((0, n_pad - n), (0, f_in_p[0] - nfeat))).astype(jnp.bfloat16)
    adj_p = jnp.pad(adj, ((0, n_pad - n), (0, n_pad - n))).astype(jnp.bfloat16)

    w_p = []
    for w, fi, fip, fo, fop in zip(params, f_ins, f_in_p, f_outs, f_out_p):
        wp = jnp.zeros((2 * fip, fop), jnp.float32)
        wp = wp.at[:fi, :fo].set(w[:fi, :])            # "self" half (multiplies x)
        wp = wp.at[fip:fip + fi, :fo].set(w[fi:, :])   # "neighbor" half (multiplies mes)
        w_p.append(wp.astype(jnp.bfloat16))

    meta = dict(n=n, nclass=nclass, n_pad=n_pad,
                layer_dims=tuple(zip(f_in_p, f_out_p)))
    return x_p, adj_p, w_p, meta


# ---------------------------------------------------------------------------
# Path 1: fused resident kernel (all layers in one pallas_call)
# ---------------------------------------------------------------------------
def _fused_graphsage_kernel(x_ref, adj_ref, *refs, layer_dims):
    n_layers = len(layer_dims)
    w_refs = refs[:n_layers]
    o_ref = refs[n_layers]
    cat_ref = refs[n_layers + 1]   # VMEM scratch for concat([x, mes])

    adj = adj_ref[...]             # bf16 [N, N], DMA'd into VMEM once
    x = x_ref[...]                 # bf16 [N, F0_pad]

    for l in range(n_layers):
        f_in_pad, f_out_pad = layer_dims[l]
        w_ref = w_refs[l]

        if f_out_pad < f_in_pad:
            # Re-associate so the N x N matmul runs at the narrower width.
            w_top = w_ref[:f_in_pad, :]
            w_bot = w_ref[f_in_pad:2 * f_in_pad, :]
            xw = jnp.dot(x, w_bot, preferred_element_type=jnp.float32)
            out = jnp.dot(adj, xw.astype(jnp.bfloat16),
                          preferred_element_type=jnp.float32)
            out = out + jnp.dot(x, w_top, preferred_element_type=jnp.float32)
        else:
            # Single concat-style matmul: doubled K fill, one MXU pass, no VPU add.
            mes = jnp.dot(adj, x, preferred_element_type=jnp.float32)
            cat_ref[:, :f_in_pad] = x                              # lane-aligned
            cat_ref[:, f_in_pad:2 * f_in_pad] = mes.astype(jnp.bfloat16)
            out = jnp.dot(cat_ref[:, :2 * f_in_pad], w_ref[...],
                          preferred_element_type=jnp.float32)

        if l < n_layers - 1:
            # ReLU for hidden layers; dropout is identity in eval mode.
            x = jnp.maximum(out, 0.0).astype(jnp.bfloat16)
        else:
            o_ref[...] = out.astype(o_ref.dtype)   # lane-dense (f_out_pad % 128 == 0)


def _forward_fused(x_p, adj_p, w_p, layer_dims, vmem_limit):
    n_pad = x_p.shape[0]
    f_out_last = layer_dims[-1][1]
    f_cat_max = max(2 * fi for fi, _ in layer_dims)

    kernel = functools.partial(_fused_graphsage_kernel, layer_dims=layer_dims)

    def full_spec(shape):
        return pl.BlockSpec(shape, lambda: (0,) * len(shape))

    return pl.pallas_call(
        kernel,
        out_shape=jax.ShapeDtypeStruct((n_pad, f_out_last), jnp.float32),
        in_specs=[full_spec(x_p.shape), full_spec(adj_p.shape)]
                + [full_spec(w.shape) for w in w_p],
        out_specs=full_spec((n_pad, f_out_last)),
        scratch_shapes=[pltpu.VMEM((n_pad, f_cat_max), jnp.bfloat16)],
        compiler_params=pltpu.CompilerParams(vmem_limit_bytes=vmem_limit),
    )(x_p, adj_p, *w_p)


def _fused_fits(n_pad, layer_dims, vmem_limit):
    """Rough resident-footprint estimate (bf16 operands, 2x for double buffers)."""
    f_cat_max = max(2 * fi for fi, _ in layer_dims)
    f_wide = max(max(fi, fo) for fi, fo in layer_dims)
    adj_b = n_pad * n_pad * 2
    x_b = n_pad * f_wide * 2
    w_b = sum(2 * fi * fo * 2 for fi, fo in layer_dims)
    out_b = n_pad * layer_dims[-1][1] * 4
    cat_b = n_pad * f_cat_max * 2
    tmp_b = 2 * n_pad * f_wide * 4
    est = 2 * (adj_b + x_b + w_b + out_b) + cat_b + tmp_b
    return est <= vmem_limit // 2


# ---------------------------------------------------------------------------
# Path 2: tiled per-layer kernel (scales beyond resident VMEM; parallel rows)
# ---------------------------------------------------------------------------
def _sage_layer_tiled_kernel(adj_ref, xk_ref, xi_ref, w_ref, o_ref,
                             acc_ref, cat_ref, *, f_in_pad, apply_relu):
    k = pl.program_id(1)

    @pl.when(k == 0)
    def _():
        acc_ref[...] = jnp.zeros_like(acc_ref)

    # mes[i_slab] += adj[i_slab, k_blk] @ x[k_blk]   (bf16 MXU, f32 accumulate)
    acc_ref[...] += jnp.dot(adj_ref[...], xk_ref[...],
                            preferred_element_type=jnp.float32)

    @pl.when(k == pl.num_programs(1) - 1)
    def _():
        # concat([x_slab, mes_slab]) @ W as a single matmul.
        cat_ref[:, :f_in_pad] = xi_ref[...]
        cat_ref[:, f_in_pad:] = acc_ref[...].astype(jnp.bfloat16)
        out = jnp.dot(cat_ref[...], w_ref[...],
                      preferred_element_type=jnp.float32)
        if apply_relu:
            out = jnp.maximum(out, 0.0)
        o_ref[...] = out.astype(o_ref.dtype)


def _choose_adj_tiles(n_pad, row_tile, k_tile):
    # row_tile must divide k_tile so n_tiled is a multiple of both.
    if n_pad <= row_tile:
        return n_pad, n_pad, n_pad
    n_tiled = _round_up(n_pad, k_tile)
    return row_tile, k_tile, n_tiled


def _forward_tiled(x_p, adj_p, w_p, layer_dims, vmem_limit,
                   row_tile=256, k_tile=512):
    # TODO(synk): on v5e (4x128^2 MXU), 128-multiple tiles are sufficient;
    # the 256/512 defaults target v6e/v7x and v7x megacore row-sharding.
    n_pad = x_p.shape[0]
    tm, tk, n_tiled = _choose_adj_tiles(n_pad, row_tile, k_tile)
    if n_tiled != n_pad:
        x_p = jnp.pad(x_p, ((0, n_tiled - n_pad), (0, 0)))
        adj_p = jnp.pad(adj_p, ((0, n_tiled - n_pad), (0, n_tiled - n_pad)))

    n_layers = len(w_p)
    x = x_p
    for l, (w, (f_in_pad, f_out_pad)) in enumerate(zip(w_p, layer_dims)):
        last = (l == n_layers - 1)
        out_dtype = jnp.float32 if last else jnp.bfloat16
        kernel = functools.partial(_sage_layer_tiled_kernel,
                                   f_in_pad=f_in_pad, apply_relu=not last)
        x = pl.pallas_call(
            kernel,
            out_shape=jax.ShapeDtypeStruct((n_tiled, f_out_pad), out_dtype),
            grid=(n_tiled // tm, n_tiled // tk),
            in_specs=[
                pl.BlockSpec((tm, tk), lambda i, k: (i, k)),         # adj block
                pl.BlockSpec((tk, f_in_pad), lambda i, k: (k, 0)),   # x K-stream (aggregate)
                pl.BlockSpec((tm, f_in_pad), lambda i, k: (i, 0)),   # x row slab (self term)
                pl.BlockSpec(w.shape, lambda i, k: (0, 0)),          # weights, resident
            ],
            out_specs=pl.BlockSpec((tm, f_out_pad), lambda i, k: (i, 0)),
            scratch_shapes=[
                pltpu.VMEM((tm, f_in_pad), jnp.float32),       # mes accumulator
                pltpu.VMEM((tm, 2 * f_in_pad), jnp.bfloat16),  # concat staging
            ],
            compiler_params=pltpu.CompilerParams(
                dimension_semantics=("parallel", "arbitrary"),
                vmem_limit_bytes=vmem_limit),
        )(adj_p, x, x, w)
    return x


# ---------------------------------------------------------------------------
# Forward wrappers
# ---------------------------------------------------------------------------
def graphsage_forward_padded(x_p, adj_p, w_p, meta, *, force_tiled=False):
    n, nclass = meta["n"], meta["nclass"]
    n_pad, layer_dims = meta["n_pad"], meta["layer_dims"]
    vmem_limit = _vmem_limit_bytes()

    if not force_tiled and _fused_fits(n_pad, layer_dims, vmem_limit):
        out = _forward_fused(x_p, adj_p, w_p, layer_dims, vmem_limit)
    else:
        out = _forward_tiled(x_p, adj_p, w_p, layer_dims, vmem_limit)
    return out[:n, :nclass]


def graphsage_forward(params, x, adj, **kw):
    # TODO(synk): for repeated forward calls, hoist prepare_graphsage_inputs
    # to data-prep time so the N^2 adjacency is not re-padded every call.
    return graphsage_forward_padded(*prepare_graphsage_inputs(params, x, adj), **kw)


# ---------------------------------------------------------------------------
# Parameter init (matches the PyTorch xavier_uniform_ on [2*F_in, F_out])
# ---------------------------------------------------------------------------
def xavier_uniform(key, shape, dtype=jnp.float32):
    fan_in, fan_out = shape
    bound = jnp.sqrt(6.0 / (fan_in + fan_out))
    return jax.random.uniform(key, shape, dtype, minval=-bound, maxval=bound)


def init_graphsage_params(key, nfeat, nhid, nclass, graph_hops):
    dims = [(nfeat, nhid)] + [(nhid, nhid)] * (graph_hops - 2) + [(nhid, nclass)]
    keys = jax.random.split(key, len(dims))
    return [xavier_uniform(k, (2 * di, do)) for k, (di, do) in zip(keys, dims)]


# ---------------------------------------------------------------------------
# Main
# ---------------------------------------------------------------------------
if __name__ == "__main__":
    nfeat, nhid, nclass, graph_hops = 16, 32, 8, 3
    num_nodes = 8

    key = jax.random.PRNGKey(0)
    k_x, k_adj, k_p = jax.random.split(key, 3)

    x = jax.random.normal(k_x, (num_nodes, nfeat), jnp.float32)
    adj_raw = jax.random.uniform(k_adj, (num_nodes, num_nodes), jnp.float32)
    adj = adj_raw / jnp.sum(adj_raw, axis=-1, keepdims=True)   # row-normalized

    params = init_graphsage_params(k_p, nfeat, nhid, nclass, graph_hops)

    prepared = prepare_graphsage_inputs(params, x, adj)
    out_fused = graphsage_forward_padded(*prepared)                     # resident fused path
    out_tiled = graphsage_forward_padded(*prepared, force_tiled=True)   # tiled per-layer path
    jax.block_until_ready((out_fused, out_tiled))

    # Pure-JAX reference with the same bf16-operand / f32-accumulation casting.
    def ref_forward(params, x, adj):
        xb = x.astype(jnp.bfloat16)
        ab = adj.astype(jnp.bfloat16)
        o = None
        for i, w in enumerate(params):
            wb = w.astype(jnp.bfloat16)
            mes = jnp.dot(ab, xb, preferred_element_type=jnp.float32).astype(jnp.bfloat16)
            o = jnp.dot(jnp.concatenate([xb, mes], axis=-1), wb,
                        preferred_element_type=jnp.float32)
            if i < len(params) - 1:
                o = jnp.maximum(o, 0.0)
            xb = o.astype(jnp.bfloat16)
        return o

    ref = ref_forward(params, x, adj)

    assert out_fused.shape == (num_nodes, nclass)
    assert out_tiled.shape == (num_nodes, nclass)
    assert jnp.allclose(out_fused, ref, atol=2e-2, rtol=2e-2)
    assert jnp.allclose(out_tiled, ref, atol=2e-2, rtol=2e-2)

    print("KERNEL_OK")
</pallas_src>

<mosaic_0001>
module attributes {stable_mosaic.version = 11 : i64} {
  func.func @_fused_graphsage_kernel(%arg0: memref<16x128xbf16, #tpu.memory_space<vmem>>, %arg1: memref<16x16xbf16, #tpu.memory_space<vmem>>, %arg2: memref<256x128xbf16, #tpu.memory_space<vmem>>, %arg3: memref<256x128xbf16, #tpu.memory_space<vmem>>, %arg4: memref<256x128xbf16, #tpu.memory_space<vmem>>, %arg5: memref<16x128xf32, #tpu.memory_space<vmem>>, %arg6: memref<16x256xbf16, #tpu.memory_space<vmem>>) attributes {dimension_semantics = [], scalar_prefetch = 0 : i64, scratch_operands = 1 : i64, tpu.core_type = #tpu.core_type<tc>} {
    %c0 = arith.constant 0 : index
    %c0_0 = arith.constant 0 : index
    %0 = vector.load %arg1[%c0, %c0_0] : memref<16x16xbf16, #tpu.memory_space<vmem>>, vector<16x16xbf16>
    %c0_1 = arith.constant 0 : index
    %c0_2 = arith.constant 0 : index
    %1 = vector.load %arg0[%c0_1, %c0_2] : memref<16x128xbf16, #tpu.memory_space<vmem>>, vector<16x128xbf16>
    %cst = arith.constant dense<0.000000e+00> : vector<16x128xf32>
    %2 = tpu.matmul %0, %1, %cst {dimension_numbers = #tpu.dot_dimension_numbers<[1], [0], [0], [1], [0, 0, 1, 1], [], []>} : vector<16x16xbf16>, vector<16x128xbf16>, vector<16x128xf32> -> vector<16x128xf32>
    %c0_3 = arith.constant 0 : index
    %c0_4 = arith.constant 0 : index
    %3 = vector.load %arg6[%c0_3, %c0_4] : memref<16x256xbf16, #tpu.memory_space<vmem>>, vector<16x128xbf16>
    tpu.vector_store %arg6[%c0_3, %c0_4], %1 {strides = array<i32>} : memref<16x256xbf16, #tpu.memory_space<vmem>>, vector<16x128xbf16>,
    %4 = arith.truncf %2 : vector<16x128xf32> to vector<16x128xbf16>
    %c0_5 = arith.constant 0 : index
    %c128 = arith.constant 128 : index
    %5 = vector.load %arg6[%c0_5, %c128] : memref<16x256xbf16, #tpu.memory_space<vmem>>, vector<16x128xbf16>
    tpu.vector_store %arg6[%c0_5, %c128], %4 {strides = array<i32>} : memref<16x256xbf16, #tpu.memory_space<vmem>>, vector<16x128xbf16>,
    %c0_6 = arith.constant 0 : index
    %c0_7 = arith.constant 0 : index
    %6 = vector.load %arg6[%c0_6, %c0_7] : memref<16x256xbf16, #tpu.memory_space<vmem>>, vector<16x256xbf16>
    %c0_8 = arith.constant 0 : index
    %c0_9 = arith.constant 0 : index
    %7 = vector.load %arg2[%c0_8, %c0_9] : memref<256x128xbf16, #tpu.memory_space<vmem>>, vector<256x128xbf16>
    %cst_10 = arith.constant dense<0.000000e+00> : vector<16x128xf32>
    %8 = tpu.matmul %6, %7, %cst_10 {dimension_numbers = #tpu.dot_dimension_numbers<[1], [0], [0], [1], [0, 0, 1, 1], [], []>} : vector<16x256xbf16>, vector<256x128xbf16>, vector<16x128xf32> -> vector<16x128xf32>
    %cst_11 = arith.constant 0.000000e+00 : f32
    %9 = vector.broadcast %cst_11 : f32 to vector<16x128xf32>
    %10 = arith.maximumf %8, %9 : vector<16x128xf32>
    %11 = arith.truncf %10 : vector<16x128xf32> to vector<16x128xbf16>
    %cst_12 = arith.constant dense<0.000000e+00> : vector<16x128xf32>
    %12 = tpu.matmul %0, %11, %cst_12 {dimension_numbers = #tpu.dot_dimension_numbers<[1], [0], [0], [1], [0, 0, 1, 1], [], []>} : vector<16x16xbf16>, vector<16x128xbf16>, vector<16x128xf32> -> vector<16x128xf32>
    %c0_13 = arith.constant 0 : index
    %c0_14 = arith.constant 0 : index
    %13 = vector.load %arg6[%c0_13, %c0_14] : memref<16x256xbf16, #tpu.memory_space<vmem>>, vector<16x128xbf16>
    tpu.vector_store %arg6[%c0_13, %c0_14], %11 {strides = array<i32>} : memref<16x256xbf16, #tpu.memory_space<vmem>>, vector<16x128xbf16>,
    %14 = arith.truncf %12 : vector<16x128xf32> to vector<16x128xbf16>
    %c0_15 = arith.constant 0 : index
    %c128_16 = arith.constant 128 : index
    %15 = vector.load %arg6[%c0_15, %c128_16] : memref<16x256xbf16, #tpu.memory_space<vmem>>, vector<16x128xbf16>
    tpu.vector_store %arg6[%c0_15, %c128_16], %14 {strides = array<i32>} : memref<16x256xbf16, #tpu.memory_space<vmem>>, vector<16x128xbf16>,
    %c0_17 = arith.constant 0 : index
    %c0_18 = arith.constant 0 : index
    %16 = vector.load %arg6[%c0_17, %c0_18] : memref<16x256xbf16, #tpu.memory_space<vmem>>, vector<16x256xbf16>
    %c0_19 = arith.constant 0 : index
    %c0_20 = arith.constant 0 : index
    %17 = vector.load %arg3[%c0_19, %c0_20] : memref<256x128xbf16, #tpu.memory_space<vmem>>, vector<256x128xbf16>
    %cst_21 = arith.constant dense<0.000000e+00> : vector<16x128xf32>
    %18 = tpu.matmul %16, %17, %cst_21 {dimension_numbers = #tpu.dot_dimension_numbers<[1], [0], [0], [1], [0, 0, 1, 1], [], []>} : vector<16x256xbf16>, vector<256x128xbf16>, vector<16x128xf32> -> vector<16x128xf32>
    %cst_22 = arith.constant 0.000000e+00 : f32
    %19 = vector.broadcast %cst_22 : f32 to vector<16x128xf32>
    %20 = arith.maximumf %18, %19 : vector<16x128xf32>
    %21 = arith.truncf %20 : vector<16x128xf32> to vector<16x128xbf16>
    %cst_23 = arith.constant dense<0.000000e+00> : vector<16x128xf32>
    %22 = tpu.matmul %0, %21, %cst_23 {dimension_numbers = #tpu.dot_dimension_numbers<[1], [0], [0], [1], [0, 0, 1, 1], [], []>} : vector<16x16xbf16>, vector<16x128xbf16>, vector<16x128xf32> -> vector<16x128xf32>
    %c0_24 = arith.constant 0 : index
    %c0_25 = arith.constant 0 : index
    %23 = vector.load %arg6[%c0_24, %c0_25] : memref<16x256xbf16, #tpu.memory_space<vmem>>, vector<16x128xbf16>
    tpu.vector_store %arg6[%c0_24, %c0_25], %21 {strides = array<i32>} : memref<16x256xbf16, #tpu.memory_space<vmem>>, vector<16x128xbf16>,
    %24 = arith.truncf %22 : vector<16x128xf32> to vector<16x128xbf16>
    %c0_26 = arith.constant 0 : index
    %c128_27 = arith.constant 128 : index
    %25 = vector.load %arg6[%c0_26, %c128_27] : memref<16x256xbf16, #tpu.memory_space<vmem>>, vector<16x128xbf16>
    tpu.vector_store %arg6[%c0_26, %c128_27], %24 {strides = array<i32>} : memref<16x256xbf16, #tpu.memory_space<vmem>>, vector<16x128xbf16>,
    %c0_28 = arith.constant 0 : index
    %c0_29 = arith.constant 0 : index
    %26 = vector.load %arg6[%c0_28, %c0_29] : memref<16x256xbf16, #tpu.memory_space<vmem>>, vector<16x256xbf16>
    %c0_30 = arith.constant 0 : index
    %c0_31 = arith.constant 0 : index
    %27 = vector.load %arg4[%c0_30, %c0_31] : memref<256x128xbf16, #tpu.memory_space<vmem>>, vector<256x128xbf16>
    %cst_32 = arith.constant dense<0.000000e+00> : vector<16x128xf32>
    %28 = tpu.matmul %26, %27, %cst_32 {dimension_numbers = #tpu.dot_dimension_numbers<[1], [0], [0], [1], [0, 0, 1, 1], [], []>} : vector<16x256xbf16>, vector<256x128xbf16>, vector<16x128xf32> -> vector<16x128xf32>
    %c0_33 = arith.constant 0 : index
    %c0_34 = arith.constant 0 : index
    %29 = vector.load %arg5[%c0_33, %c0_34] : memref<16x128xf32, #tpu.memory_space<vmem>>, vector<16x128xf32>
    tpu.vector_store %arg5[%c0_33, %c0_34], %28 {strides = array<i32>} : memref<16x128xf32, #tpu.memory_space<vmem>>, vector<16x128xf32>,
    return
  }
}

</mosaic_0001>

<bundles_post_ra>
// kernel: tpu_custom_call.1
= control target key start
LH: loop header
LB: loop body
LE: loop exit
PB: predicated region body
PF: predicated region fallthrough
CT: control target
= control target key end

     0   :  { %10 = vsyncpa [#allocation4], 0  ;;  %s1286_s0 = inlined_call_operand.hbm [shape: bf16[16,128], index: 0, kind: input, shape index: {}]   ;;  %s1287_s1 = inlined_call_operand.hbm [shape: bf16[16,16], index: 1, kind: input, shape index: {}]   ;;  %s1288_s2 = inlined_call_operand.hbm [shape: bf16[256,128], index: 2, kind: input, shape index: {}]   ;;  %s1289_s3 = inlined_call_operand.hbm [shape: bf16[256,128], index: 3, kind: input, shape index: {}]   ;;  %s1290_s4 = inlined_call_operand.hbm [shape: bf16[256,128], index: 4, kind: input, shape index: {}]   ;;  %s1291_s5 = inlined_call_operand.hbm [shape: f32[16,128], index: 5, kind: output, shape index: {}]  }
   0x1   :  { %11 = vsyncpa [#allocation7], 0 }
   0x2   :  { %12 = vsyncpa [#allocation10], 0 }
   0x3   :  { %13 = vsyncpa [#allocation5], 0  ;;  %s1126_s18 = smov [#allocation6]   ;;  %s1127_s20 = smov [#allocation9]  }
   0x4   :  { %s31_s19 = sshll.u32 %s1126_s18, 4  ;;  %s55_s21 = sshll.u32 %s1127_s20, 4  ;;  %s32_s19 = int_to_ptr.vmem [resolvable:$true] %s31_s19  ;;  %s1168_s21 = int_to_ptr.vmem [resolvable:$true] %s55_s21 }
   0x5   :  { %s986_s24 = scalar_lea.hbm %s1287_s1, 128 }
   0x6   :  { %p987_p0 = scmp.ne.s32.totalorder %s1287_s1, %s986_s24  ;;  %p990_p1 = scmp.lt.u32.totalorder %s986_s24, %s1287_s1 }
   0x8   :  { %p992_p2 = pnand %p990_p1, %p987_p0 }
   0xa   :  { %995 = shalt.err (!%p992_p2)
}
   0xb   :  { %s996_s29 = scalar_lea.vmem %s32_s19, 128  ;;  %p1001_p4 = scmp.lt.s32.totalorder %s32_s19, %s32_s19 }
   0xc   :  { %p997_p3 = scmp.ne.s32.totalorder %s32_s19, %s996_s29  ;;  %p1002_p5 = scmp.lt.s32.totalorder %s996_s29, %s996_s29 }
   0xe   :  { %p1003_p6 = por %p1002_p5, %p1001_p4 }
  0x10   :  { %p1004_p7 = pnand %p1003_p6, %p997_p3 }
  0x12   :  { %1007 = shalt.err (!%p1004_p7)
}
  0x13   :  { %s1128_s30 = smov 64   ;;  %s1129_s6 = smov 4  }
  0x14   :  { %37 = dma.hbm_to_vmem [thread:$0]  %s1287_s1, 128, %s32_s19, [#allocation7], %s1128_s30, %s1128_s30, %s1129_s6  }
  0x15   :  { %s1008_s11 = scalar_lea.hbm %s1289_s3, 2048 }
  0x16   :  { %p1009_p8 = scmp.ne.s32.totalorder %s1289_s3, %s1008_s11  ;;  %p1012_p9 = scmp.lt.u32.totalorder %s1008_s11, %s1289_s3 }
  0x18   :  { %p1014_p10 = pnand %p1012_p9, %p1009_p8 }
  0x1a   :  { %1017 = shalt.err (!%p1014_p10)
}
  0x1b   :  { %s1018_s16 = scalar_lea.vmem %s1168_s21, 2048  ;;  %p1023_p12 = scmp.lt.s32.totalorder %s1168_s21, %s1168_s21 }
  0x1c   :  { %p1019_p11 = scmp.ne.s32.totalorder %s1168_s21, %s1018_s16  ;;  %p1024_p13 = scmp.lt.s32.totalorder %s1018_s16, %s1018_s16 }
  0x1e   :  { %p1025_p0 = por %p1024_p13, %p1023_p12 }
  0x20   :  { %p1026_p1 = pnand %p1025_p0, %p1019_p11 }
  0x22   :  { %1029 = shalt.err (!%p1026_p1)
}
  0x23   :  { %61 = dma.hbm_to_vmem [thread:$0]  %s1289_s3, 2048, %s1168_s21, [#allocation10], %s1128_s30, %s1128_s30, %s1129_s6  }
  0x24   :  { %s1130_s18 = smov [#allocation3]   ;;  %s1131_s20 = smov [#allocation8]  }
  0x25   :  { %s19_s19 = sshll.u32 %s1130_s18, 4  ;;  %s43_s22 = sshll.u32 %s1131_s20, 4  ;;  %s20_s19 = int_to_ptr.vmem [resolvable:$true] %s19_s19  ;;  %s1205_s22 = int_to_ptr.vmem [resolvable:$true] %s43_s22 }
  0x26   :  { %s1030_s25 = scalar_lea.hbm %s1286_s0, 128 }
  0x27   :  { %p1031_p2 = scmp.ne.s32.totalorder %s1286_s0, %s1030_s25  ;;  %p1034_p3 = scmp.lt.u32.totalorder %s1030_s25, %s1286_s0 }
  0x29   :  { %p1036_p4 = pnand %p1034_p3, %p1031_p2 }
  0x2b   :  { %1039 = shalt.err (!%p1036_p4)
}
  0x2c   :  { %s1040_s3 = scalar_lea.vmem %s20_s19, 128  ;;  %p1045_p6 = scmp.lt.s32.totalorder %s20_s19, %s20_s19 }
  0x2d   :  { %p1041_p5 = scmp.ne.s32.totalorder %s20_s19, %s1040_s3  ;;  %p1046_p7 = scmp.lt.s32.totalorder %s1040_s3, %s1040_s3 }
  0x2f   :  { %p1047_p8 = por %p1046_p7, %p1045_p6 }
  0x31   :  { %p1048_p9 = pnand %p1047_p8, %p1041_p5 }
  0x33   :  { %1051 = shalt.err (!%p1048_p9)
}
  0x34   :  { %25 = dma.hbm_to_vmem [thread:$0]  %s1286_s0, 128, %s20_s19, [#allocation4], %s1128_s30, %s1128_s30, %s1129_s6  }
  0x35   :  { %s1052_s10 = scalar_lea.hbm %s1288_s2, 2048 }
  0x36   :  { %p1053_p10 = scmp.ne.s32.totalorder %s1288_s2, %s1052_s10  ;;  %p1056_p11 = scmp.lt.u32.totalorder %s1052_s10, %s1288_s2 }
  0x38   :  { %p1058_p12 = pnand %p1056_p11, %p1053_p10 }
  0x3a   :  { %1061 = shalt.err (!%p1058_p12)
}
  0x3b   :  { %s1062_s15 = scalar_lea.vmem %s1205_s22, 2048  ;;  %p1067_p0 = scmp.lt.s32.totalorder %s1205_s22, %s1205_s22 }
  0x3c   :  { %p1063_p13 = scmp.ne.s32.totalorder %s1205_s22, %s1062_s15  ;;  %p1068_p1 = scmp.lt.s32.totalorder %s1062_s15, %s1062_s15 }
  0x3e   :  { %p1069_p2 = por %p1068_p1, %p1067_p0 }
  0x40   :  { %p1070_p3 = pnand %p1069_p2, %p1063_p13 }
  0x42   :  { %1073 = shalt.err (!%p1070_p3)
}
  0x43   :  { %49 = dma.hbm_to_vmem [thread:$0]  %s1288_s2, 2048, %s1205_s22, [#allocation7], %s1128_s30, %s1128_s30, %s1129_s6  }
  0x44   :  { %s1132_s1 = smov [#allocation11]   ;;  %s1074_s20 = scalar_lea.hbm %s1290_s4, 2048 }
  0x45   :  { %s67_s17 = sshll.u32 %s1132_s1, 4  ;;  %p1075_p4 = scmp.ne.s32.totalorder %s1290_s4, %s1074_s20  ;;  %s68_s17 = int_to_ptr.vmem [resolvable:$true] %s67_s17 }
  0x46   :  { %p1078_p5 = scmp.lt.u32.totalorder %s1074_s20, %s1290_s4 }
  0x48   :  { %p1080_p6 = pnand %p1078_p5, %p1075_p4 }
  0x4a   :  { %1083 = shalt.err (!%p1080_p6)
}
  0x4b   :  { %s1084_s27 = scalar_lea.vmem %s68_s17, 2048  ;;  %p1089_p8 = scmp.lt.s32.totalorder %s68_s17, %s68_s17 }
  0x4c   :  { %p1085_p7 = scmp.ne.s32.totalorder %s68_s17, %s1084_s27  ;;  %p1090_p9 = scmp.lt.s32.totalorder %s1084_s27, %s1084_s27 }
  0x4e   :  { %p1091_p10 = por %p1090_p9, %p1089_p8 }
  0x50   :  { %p1092_p11 = pnand %p1091_p10, %p1085_p7 }
  0x52   :  { %1095 = shalt.err (!%p1092_p11)
}
  0x53   :  { %73 = dma.hbm_to_vmem [thread:$0]  %s1290_s4, 2048, %s68_s17, [#allocation10], %s1128_s30, %s1128_s30, %s1129_s6  }
  0x54   :  { %1118 = dma.done.wait [#allocation4], 128  }
  0x55   :  { %1119 = vsyncadd [#allocation4], 4294967168 }
  0x56   :  { %1120 = dma.done.wait [#allocation7], 2176  }
  0x57   :  { %1121 = vsyncadd [#allocation7], 4294965120 }
  0x58   :  { %1122 = dma.done.wait [#allocation10], 4096  }
  0x59   :  { %1123 = vsyncadd [#allocation10], 4294963200  ;;  %v1133_v0 = vmov 0.0   ;;  %vm1134_vm0 = vmmov 0   ;;  %v936_v1 = vld [vmem:[#allocation3] sm:$0xff]   ;;  %v1260_v2 = vld [vmem:[#allocation6] sm:$0xff]  }
  0x5a   :  { %906 = vmatprep.subr.bf16.mxu0 %v1133_v0  ;;  %908 = vmatprep.mubr.msk.bf16.mxu0 %vm1134_vm0, %v1133_v0  ;;  %vm105_vm1 = vcmask 130048   ;;  %v938_v3 = vld [vmem:[#allocation8 + $0x40] sm:$0xff]   ;;  %v940_v5 = vld [vmem:[#allocation8 + $0x48] sm:$0xff]   ;;  %v942_v7 = vld [vmem:[#allocation8 + $0x50] sm:$0xff]   ;;  %s1135_s4 = smov [#allocation12]  }
  0x5b   :  { %907 = vmatpush3.bf16.msra.mxu0 %v936_v1  ;;  %v939_v4 = vld [vmem:[#allocation8] sm:$0xff]   ;;  %836 = vmatprep.subr.bf16.mxu1 %v938_v3  ;;  %v941_v6 = vld [vmem:[#allocation8 + $0x8] sm:$0xff]   ;;  %v943_v8 = vld [vmem:[#allocation8 + $0x10] sm:$0xff]   ;;  %s767_s30 = sshll.u32 %s1135_s4, 4  ;;  %s768_s30 = int_to_ptr.vmem [resolvable:$true] %s767_s30 }
  0x5c   :  { %912 = vmatprep.subr.bf16.mxu0 %v1133_v0  ;;  %837 = vmatpush3.bf16.msra.mxu1 %v939_v4  ;;  %v944_v9 = vld [vmem:[#allocation8 + $0x58] sm:$0xff]   ;;  %v946_v11 = vld [vmem:[#allocation8 + $0x60] sm:$0xff]   ;;  %v948_v13 = vld [vmem:[#allocation8 + $0x68] sm:$0xff]   ;;  %s1096_s6 = scalar_lea.vmem %s768_s30, 256  ;;  %p1101_p13 = scmp.lt.s32.totalorder %s768_s30, %s768_s30 }
  0x5d   :  { %838 = vmatprep.subr.bf16.mxu1 %v940_v5  ;;  %v945_v10 = vld [vmem:[#allocation8 + $0x18] sm:$0xff]   ;;  %v947_v12 = vld [vmem:[#allocation8 + $0x20] sm:$0xff]   ;;  %v949_v14 = vld [vmem:[#allocation8 + $0x28] sm:$0xff]   ;;  %p1097_p12 = scmp.ne.s32.totalorder %s768_s30, %s1096_s6  ;;  %p1102_p0 = scmp.lt.s32.totalorder %s1096_s6, %s1096_s6 }
  0x5e   :  { %909 = vmatmul.mubr.msk.bf16.vlgmr.msra.gmra.mrb[0].mxu0 %vm105_vm1, %v1260_v2  ;;  %v950_v15 = vld [vmem:[#allocation8 + $0x70] sm:$0xff]   ;;  %v952_v17 = vld [vmem:[#allocation8 + $0x78] sm:$0xff]   ;;  %v954_v32 = vld [vmem:[#allocation9 + $0x40] sm:$0xff]  }
  0x5f   :  { %914 = vmatprep.mubr.msk.bf16.mxu0 %vm1134_vm0, %v1133_v0  ;;  %v951_v16 = vld [vmem:[#allocation8 + $0x30] sm:$0xff]   ;;  %v953_v18 = vld [vmem:[#allocation8 + $0x38] sm:$0xff]   ;;  %v955_v34 = vld [vmem:[#allocation9] sm:$0xff]   ;;  %p1103_p1 = por %p1102_p0, %p1101_p13 }
  0x60   :  { %839 = vmatpush3.bf16.msra.mxu1 %v941_v6  ;;  %v956_v35 = vld [vmem:[#allocation9 + $0x48] sm:$0xff]   ;;  %v958_v37 = vld [vmem:[#allocation9 + $0x50] sm:$0xff]   ;;  %v960_v39 = vld [vmem:[#allocation9 + $0x58] sm:$0xff]  }
  0x61   :  { %840 = vmatprep.subr.bf16.mxu1 %v942_v7  ;;  %v957_v36 = vld [vmem:[#allocation9 + $0x8] sm:$0xff]   ;;  %v959_v38 = vld [vmem:[#allocation9 + $0x10] sm:$0xff]   ;;  %v961_v40 = vld [vmem:[#allocation9 + $0x18] sm:$0xff]   ;;  %p1104_p2 = pnand %p1103_p1, %p1097_p12 }
  0x62   :  { %v962_v41 = vld [vmem:[#allocation9 + $0x60] sm:$0xff]   ;;  %v964_v43 = vld [vmem:[#allocation9 + $0x68] sm:$0xff]   ;;  %v966_v45 = vld [vmem:[#allocation9 + $0x70] sm:$0xff]  }
  0x63   :  { %v963_v42 = vld [vmem:[#allocation9 + $0x20] sm:$0xff]   ;;  %v965_v44 = vld [vmem:[#allocation9 + $0x28] sm:$0xff]   ;;  %v967_v46 = vld [vmem:[#allocation9 + $0x30] sm:$0xff]  }
  0x64   :  { %841 = vmatpush3.bf16.msra.mxu1 %v943_v8  ;;  %v968_v47 = vld [vmem:[#allocation9 + $0x78] sm:$0xff]   ;;  %v970_v54 = vld [vmem:[#allocation11 + $0x40] sm:$0xff]   ;;  %v972_v56 = vld [vmem:[#allocation11 + $0x48] sm:$0xff]  }
  0x65   :  { %842 = vmatprep.subr.bf16.mxu1 %v944_v9  ;;  %v969_v48 = vld [vmem:[#allocation9 + $0x38] sm:$0xff]   ;;  %v971_v55 = vld [vmem:[#allocation11] sm:$0xff]   ;;  %v973_v57 = vld [vmem:[#allocation11 + $0x8] sm:$0xff]  }
  0x66   :  { %v974_v58 = vld [vmem:[#allocation11 + $0x50] sm:$0xff]   ;;  %v976_v60 = vld [vmem:[#allocation11 + $0x58] sm:$0xff]   ;;  %v978_v62 = vld [vmem:[#allocation11 + $0x60] sm:$0xff]  }
  0x67   :  { %v975_v59 = vld [vmem:[#allocation11 + $0x10] sm:$0xff]   ;;  %v977_v61 = vld [vmem:[#allocation11 + $0x18] sm:$0xff]   ;;  %v979_v63 = vld [vmem:[#allocation11 + $0x20] sm:$0xff]  }
  0x68   :  { %843 = vmatpush3.bf16.msra.mxu1 %v945_v10  ;;  %v982_v3 = vld [vmem:[#allocation11 + $0x70] sm:$0xff]  }
  0x69   :  { %844 = vmatprep.subr.bf16.mxu1 %v946_v11  ;;  %v983_v4 = vld [vmem:[#allocation11 + $0x30] sm:$0xff]  }
  0x6c   :  { %845 = vmatpush3.bf16.msra.mxu1 %v947_v12 }
  0x6d   :  { %846 = vmatprep.subr.bf16.mxu1 %v948_v13 }
  0x70   :  { %847 = vmatpush3.bf16.msra.mxu1 %v949_v14  ;;  %v984_v14 = vld [vmem:[#allocation11 + $0x78] sm:$0xff]  }
  0x71   :  { %848 = vmatprep.subr.bf16.mxu1 %v950_v15  ;;  %v985_v15 = vld [vmem:[#allocation11 + $0x38] sm:$0xff]  }
  0x74   :  { %849 = vmatpush3.bf16.msra.mxu1 %v951_v16 }
  0x75   :  { %850 = vmatprep.subr.bf16.mxu1 %v952_v17 }
  0x78   :  { %851 = vmatpush3.bf16.msra.mxu1 %v953_v18 }
  0x79   :  { %884 = vmatprep.subr.bf16.mxu1 %v970_v54 }
 0x131   :  { %v143_v19 = vpop.f32.mrb[0].mxu0 }
 0x132   :  { %v910_v20 = vpop.f32.mrb[1].mxu0 }
 0x133   :  { %v146_v21 = vpop.f32.mrb[2].mxu0 }
 0x134   :  { %v911_v22 = vpop.f32.mrb[3].mxu0  ;;  %v151_v23 = vpack.c.bf16 %v146_v21, %v143_v19 }
 0x136   :  { %315 = vmatprep.mubr.bf16.mxu1 %v151_v23 }
 0x137   :  { %316 = vmatmul.mubr.bf16.vlgmr.msra.gmra.mrb[0].mxu1 %v936_v1  ;;  %v981_v1 = vld [vmem:[#allocation11 + $0x28] sm:$0xff]  }
 0x138   :  { %885 = vmatpush3.bf16.msra.mxu1 %v971_v55 }
 0x139   :  { %886 = vmatprep.subr.bf16.mxu1 %v972_v56 }
 0x13c   :  { %887 = vmatpush3.bf16.msra.mxu1 %v973_v57 }
 0x13d   :  { %888 = vmatprep.subr.bf16.mxu1 %v974_v58 }
 0x140   :  { %889 = vmatpush3.bf16.msra.mxu1 %v975_v59 }
 0x141   :  { %890 = vmatprep.subr.bf16.mxu1 %v976_v60 }
 0x144   :  { %891 = vmatpush3.bf16.msra.mxu1 %v977_v61 }
 0x145   :  { %892 = vmatprep.subr.bf16.mxu1 %v978_v62 }
 0x148   :  { %893 = vmatpush3.bf16.msra.mxu1 %v979_v63 }
 0x20a   :  { %v852_v24 = vpop.f32.mrb[0].mxu1 }
 0x20b   :  { %v853_v25 = vpop.f32.mrb[1].mxu1 }
 0x20c   :  { %v854_v26 = vadd.f32 %v853_v25, %v852_v24  ;;  %v855_v27 = vpop.f32.mrb[2].mxu1 }
 0x20d   :  { %v856_v28 = vpop.f32.mrb[3].mxu1 }
 0x20e   :  { %v857_v29 = vadd.f32 %v856_v28, %v855_v27  ;;  %v324_v30 = vmax.f32 %v854_v26, 0.0 }
 0x210   :  { %v325_v31 = vmax.f32 %v857_v29, 0.0 }
 0x212   :  { %v326_v33 = vpack.c.bf16 %v325_v31, %v324_v30 }
 0x214   :  { %913 = vmatpush3.bf16.msra.mxu0 %v326_v33 }
 0x215   :  { %860 = vmatprep.subr.bf16.mxu0 %v954_v32 }
 0x217   :  { %915 = vmatmul.mubr.msk.bf16.vlgmr.msra.gmra.mrb[4].mxu0 %vm105_vm1, %v1260_v2 }
 0x218   :  { %861 = vmatpush3.bf16.msra.mxu0 %v955_v34 }
 0x219   :  { %862 = vmatprep.subr.bf16.mxu0 %v956_v35 }
 0x21c   :  { %863 = vmatpush3.bf16.msra.mxu0 %v957_v36 }
 0x21d   :  { %864 = vmatprep.subr.bf16.mxu0 %v958_v37 }
 0x220   :  { %865 = vmatpush3.bf16.msra.mxu0 %v959_v38 }
 0x221   :  { %866 = vmatprep.subr.bf16.mxu0 %v960_v39 }
 0x224   :  { %867 = vmatpush3.bf16.msra.mxu0 %v961_v40 }
 0x225   :  { %868 = vmatprep.subr.bf16.mxu0 %v962_v41 }
 0x228   :  { %869 = vmatpush3.bf16.msra.mxu0 %v963_v42 }
 0x229   :  { %870 = vmatprep.subr.bf16.mxu0 %v964_v43 }
 0x22c   :  { %871 = vmatpush3.bf16.msra.mxu0 %v965_v44 }
 0x22d   :  { %872 = vmatprep.subr.bf16.mxu0 %v966_v45 }
 0x230   :  { %873 = vmatpush3.bf16.msra.mxu0 %v967_v46 }
 0x231   :  { %874 = vmatprep.subr.bf16.mxu0 %v968_v47 }
 0x234   :  { %875 = vmatpush3.bf16.msra.mxu0 %v969_v48 }
 0x235   :  { %918 = vmatprep.subr.bf16.mxu0 %v1133_v0 }
 0x2ea   :  { %v361_v49 = vpop.f32.mrb[4].mxu0 }
 0x2eb   :  { %v916_v50 = vpop.f32.mrb[5].mxu0 }
 0x2ec   :  { %v364_v51 = vpop.f32.mrb[6].mxu0 }
 0x2ed   :  { %v369_v52 = vpack.c.bf16 %v364_v51, %v361_v49  ;;  %v917_v53 = vpop.f32.mrb[7].mxu0 }
 0x2ef   :  { %533 = vmatprep.mubr.bf16.mxu0 %v369_v52 }
 0x2f0   :  { %534 = vmatmul.mubr.bf16.vlgmr.msra.gmra.mrb[8].mxu0 %v326_v33 }
 0x2f1   :  { %920 = vmatprep.mubr.msk.bf16.mxu0 %vm1134_vm0, %v1133_v0  ;;  %v980_v0 = vld [vmem:[#allocation11 + $0x68] sm:$0xff]  }
 0x2f2   :  { %894 = vmatprep.subr.bf16.mxu1 %v980_v0 }
 0x2f3   :  { %895 = vmatpush3.bf16.msra.mxu1 %v981_v1 }
 0x2f4   :  { %896 = vmatprep.subr.bf16.mxu1 %v982_v3 }
 0x2f7   :  { %897 = vmatpush3.bf16.msra.mxu1 %v983_v4 }
 0x2f8   :  { %898 = vmatprep.subr.bf16.mxu1 %v984_v14 }
 0x2fb   :  { %899 = vmatpush3.bf16.msra.mxu1 %v985_v15 }
 0x3c3   :  { %v876_v5 = vpop.f32.mrb[8].mxu0 }
 0x3c4   :  { %v877_v6 = vpop.f32.mrb[9].mxu0 }
 0x3c5   :  { %v878_v7 = vadd.f32 %v877_v6, %v876_v5  ;;  %v879_v8 = vpop.f32.mrb[10].mxu0 }
 0x3c6   :  { %v880_v9 = vpop.f32.mrb[11].mxu0 }
 0x3c7   :  { %v881_v10 = vadd.f32 %v880_v9, %v879_v8  ;;  %v542_v11 = vmax.f32 %v878_v7, 0.0 }
 0x3c9   :  { %v543_v12 = vmax.f32 %v881_v10, 0.0 }
 0x3cb   :  { %v544_v13 = vpack.c.bf16 %v543_v12, %v542_v11 }
 0x3cd   :  { %919 = vmatpush3.bf16.msra.mxu0 %v544_v13 }
 0x3d0   :  { %921 = vmatmul.mubr.msk.bf16.vlgmr.msra.gmra.mrb[12].mxu0 %vm105_vm1, %v1260_v2 }
 0x4a3   :  { %v579_v16 = vpop.f32.mrb[12].mxu0 }
 0x4a4   :  { %v922_v17 = vpop.f32.mrb[13].mxu0 }
 0x4a5   :  { %v582_v18 = vpop.f32.mrb[14].mxu0 }
 0x4a6   :  { %v587_v19 = vpack.c.bf16 %v582_v18, %v579_v16  ;;  %v923_v20 = vpop.f32.mrb[15].mxu0 }
 0x4a8   :  { %751 = vmatprep.mubr.bf16.mxu1 %v587_v19 }
 0x4a9   :  { %752 = vmatmul.mubr.bf16.vlgmr.msra.gmra.mrb[4].mxu1 %v544_v13 }
 0x57c   :  { %v900_v21 = vpop.f32.mrb[4].mxu1 }
 0x57d   :  { %v901_v22 = vpop.f32.mrb[5].mxu1 }
 0x57e   :  { %v902_v23 = vadd.f32 %v901_v22, %v900_v21  ;;  %v903_v24 = vpop.f32.mrb[6].mxu1 }
 0x57f   :  { %v904_v25 = vpop.f32.mrb[7].mxu1 }
 0x580   :  { %760 = vst [vmem:[#allocation12] sm:$0xff] %v902_v23  ;;  %v905_v2 = vadd.f32 %v904_v25, %v903_v24 }
 0x582   :  { %761 = vst [vmem:[#allocation12 + $0x8] sm:$0xff] %v905_v2 }
 0x583   :  { %1107 = shalt.err (!%p1104_p2)
}
 0x584   :  { %s1108_s3 = scalar_lea.hbm %s1291_s5, 256 }
 0x585   :  { %p1109_p3 = scmp.ne.s32.totalorder %s1291_s5, %s1108_s3  ;;  %p1112_p4 = scmp.lt.u32.totalorder %s1108_s3, %s1291_s5 }
 0x587   :  { %p1114_p5 = pnand %p1112_p4, %p1109_p3 }
 0x589   :  { %1117 = shalt.err (!%p1114_p5)
}
 0x58a   :  { %s1136_s10 = smov 128   ;;  %s1137_s11 = smov 8  }
 0x58b   :  { %773 = dma.vmem_to_hbm [thread:$0]  %s768_s30, 256, %s1291_s5, [#allocation5], %s1136_s10, %s1136_s10, %s1137_s11  }
 0x58c   :  { %1124 = dma.done.wait [#allocation5], 256  }
 0x58d   :  { %1125 = vsyncadd [#allocation5], 4294967040 }
 0x58e   :  { %777 = vsyncpa [#allocation4], 1 }
 0x58f   :  { %778 = vsyncpa [#allocation7], 1 }
 0x590   :  { %779 = vsyncpa [#allocation10], 1 }
 0x591   :  { %780 = vsyncpa [#allocation5], 1 }

</bundles_post_ra>
